<compile_context>
chip_gen: v6e
topology: v6e:2x2x1
jax: 0.10.0
libtpu: 0.0.40
codegen_flags: <defaults>
</compile_context>

<pallas_src>
import math

import jax
import jax.numpy as jnp
from jax.experimental import pallas as pl
from jax.experimental.pallas import tpu as pltpu

# --------------------------------------------------------------------------
# Tiling / VMEM policy
# --------------------------------------------------------------------------
_TM_CAP = 512            # M (sublane) tile cap
_TN_CAP = 512            # N (lane) tile cap; widened to 1024 for small-M
_TK_CAP = 1024           # K (reduction) tile cap
# Keep the double-buffered working set well under v7x's 64 MiB physical VMEM
# (v5e / v6e have 128 MiB, so this is conservative everywhere).
_WORKING_SET_BUDGET = 24 * 1024 * 1024
# Explicit scoped-VMEM limit: v5e's default is only 16 MiB; 32 MiB is safe on
# every generation (v7x physical VMEM is 64 MiB).
_VMEM_LIMIT_BYTES = 32 * 1024 * 1024


def _round_up(x, m):
    return (x + m - 1) // m * m


def _sublane(dtype):
    # dtype-aware sublane packing: f32 -> 8, bf16/f16 -> 16, int8/fp8 -> 32.
    return {4: 8, 2: 16, 1: 32}.get(jnp.dtype(dtype).itemsize, 8)


def _pick_kn_tile(dim, cap):
    """Lane-dim (K or N) tile: multiple of 128 dividing the padded extent, or a
    full-extent block (which avoids any padding). Returns (tile, padded_dim)."""
    if dim % 128 == 0:
        tile = min(cap, dim)
        while dim % tile != 0:
            tile -= 128
        return tile, dim                 # no padding needed
    if dim <= cap:
        return dim, dim                  # full-extent block, no padding
    pdim = _round_up(dim, 128)
    tile = min(cap, pdim)
    tile -= tile % 128
    while pdim % tile != 0:
        tile -= 128
    return tile, pdim


def _pick_m_tile(m, cap, sub):
    """Sublane-dim (M) tile: multiple of `sub` dividing the padded extent."""
    pm = _round_up(m, sub)
    if pm <= cap:
        return pm, pm
    tile = min(cap, pm)
    tile -= tile % sub
    while pm % tile != 0:
        tile -= sub
    return tile, pm


def _fit_vmem_budget(tm, tn, tk, comp_isz, out_isz, use_acc, sub):
    """Shrink tiles (rarely needed with the caps above) to stay under budget."""
    def ws(tm_, tn_, tk_):
        w = 2 * (tm_ * tk_ + tk_ * tn_) * comp_isz    # x + w, double-buffered
        w += 2 * tm_ * tn_ * out_isz                  # output, double-buffered
        w += 2 * tn_ * 4                              # bias
        if use_acc:
            w += tm_ * tn_ * 4                        # f32 accumulator scratch
        return w

    while ws(tm, tn, tk) > _WORKING_SET_BUDGET:
        if tk % 256 == 0:
            tk //= 2
        elif tn % 256 == 0:
            tn //= 2
        elif tm % (2 * sub) == 0:
            tm //= 2
        else:
            break
    return tm, tn, tk


# --------------------------------------------------------------------------
# Kernels
# --------------------------------------------------------------------------
def _mm_bias_kernel_f32out(x_ref, w_ref, b_ref, o_ref):
    """f32 output: accumulate directly into the resident output block."""
    k = pl.program_id(2)

    @pl.when(k == 0)
    def _():
        o_ref[...] = jnp.broadcast_to(b_ref[...], o_ref.shape)

    o_ref[...] += jnp.dot(
        x_ref[...], w_ref[...], preferred_element_type=jnp.float32
    )


def _mm_kernel_f32out(x_ref, w_ref, o_ref):
    k = pl.program_id(2)

    @pl.when(k == 0)
    def _():
        o_ref[...] = jnp.zeros_like(o_ref)

    o_ref[...] += jnp.dot(
        x_ref[...], w_ref[...], preferred_element_type=jnp.float32
    )


def _mm_bias_kernel_acc(x_ref, w_ref, b_ref, o_ref, acc_ref):
    """Non-f32 output: f32 VMEM accumulator + finalize (bias add, cast, store)."""
    k = pl.program_id(2)

    @pl.when(k == 0)
    def _():
        acc_ref[...] = jnp.zeros_like(acc_ref)

    acc_ref[...] += jnp.dot(
        x_ref[...], w_ref[...], preferred_element_type=jnp.float32
    )

    @pl.when(k == pl.num_programs(2) - 1)
    def _():
        o_ref[...] = (acc_ref[...] + b_ref[...].astype(jnp.float32)).astype(
            o_ref.dtype
        )


def _mm_kernel_acc(x_ref, w_ref, o_ref, acc_ref):
    k = pl.program_id(2)

    @pl.when(k == 0)
    def _():
        acc_ref[...] = jnp.zeros_like(acc_ref)

    acc_ref[...] += jnp.dot(
        x_ref[...], w_ref[...], preferred_element_type=jnp.float32
    )

    @pl.when(k == pl.num_programs(2) - 1)
    def _():
        o_ref[...] = acc_ref[...].astype(o_ref.dtype)


# --------------------------------------------------------------------------
# Host-side wrappers
# --------------------------------------------------------------------------
def _prepare_weight(weight, bias, compute_dtype):
    """One-time weight prep (hoisted to __init__): transpose to (K, N), cast to
    the MXU compute dtype, pad K/N to tile multiples. Returns
    (wt_padded, bias2d_padded_or_None, tn, tk)."""
    n, k = weight.shape
    tk, pk = _pick_kn_tile(k, _TK_CAP)
    tn, pn = _pick_kn_tile(n, _TN_CAP)

    wt = weight.T.astype(compute_dtype)           # (K, N) -- one-time transpose
    if (pk, pn) != (k, n):
        wt = jnp.pad(wt, ((0, pk - k), (0, pn - n)))

    b2d = None
    if bias is not None:
        b2d = bias.reshape(1, n).astype(jnp.float32)
        if pn != n:
            b2d = jnp.pad(b2d, ((0, 0), (0, pn - n)))
    return wt, b2d, tn, tk


def _linear_fwd(x, wt, b2d, n_out, tn, tk, compute_dtype):
    """y = x @ W.T (+ b), with wt already transposed/padded/cast to (pk, pn)."""
    *lead, k_in = x.shape
    pk, pn = wt.shape
    out_dtype = x.dtype
    m = math.prod(lead) if lead else 1

    x2d = x.reshape(m, k_in)
    if x2d.dtype != jnp.dtype(compute_dtype):
        x2d = x2d.astype(compute_dtype)

    sub = max(_sublane(compute_dtype), _sublane(out_dtype))
    tm, pm = _pick_m_tile(m, _TM_CAP, sub)

    if (pm, pk) != (m, k_in):
        x2d = jnp.pad(x2d, ((0, pm - m), (0, pk - k_in)))

    # Small-M (decode-like) regime is weight-bandwidth bound: widen the N tile.
    if tm <= 64:
        while tn * 2 <= 1024 and pn % (tn * 2) == 0:
            tn *= 2

    # v7x megacore: ensure >= 2 parallel grid points when cheaply possible.
    if (pm // tm) * (pn // tn) == 1 and pm % (2 * sub) == 0:
        tm = pm // 2

    comp_isz = jnp.dtype(compute_dtype).itemsize
    out_isz = jnp.dtype(out_dtype).itemsize
    use_acc = jnp.dtype(out_dtype) != jnp.dtype(jnp.float32)
    tm, tn, tk = _fit_vmem_budget(tm, tn, tk, comp_isz, out_isz, use_acc, sub)

    grid = (pm // tm, pn // tn, pk // tk)
    gm, gn, gk = grid

    # bytes_accessed including tile re-reads (x re-read per N tile, w per M tile)
    bytes_accessed = (
        pm * pk * comp_isz * gn
        + pk * pn * comp_isz * gm
        + pm * pn * out_isz
        + (pn * 4 * gm if b2d is not None else 0)
    )
    cost = pl.CostEstimate(
        flops=2 * pm * pn * pk, transcendentals=0, bytes_accessed=int(bytes_accessed)
    )

    x_spec = pl.BlockSpec((tm, tk), lambda i, j, kk: (i, kk))
    w_spec = pl.BlockSpec((tk, tn), lambda i, j, kk: (kk, j))
    o_spec = pl.BlockSpec((tm, tn), lambda i, j, kk: (i, j))
    compiler_params = pltpu.CompilerParams(
        dimension_semantics=("parallel", "parallel", "arbitrary"),
        vmem_limit_bytes=_VMEM_LIMIT_BYTES,
    )

    in_specs = [x_spec, w_spec]
    operands = [x2d, wt]
    if b2d is not None:
        in_specs.append(pl.BlockSpec((1, tn), lambda i, j, kk: (0, j)))
        operands.append(b2d)

    if use_acc:
        kernel = _mm_bias_kernel_acc if b2d is not None else _mm_kernel_acc
        scratch = [pltpu.VMEM((tm, tn), jnp.float32)]
    else:
        kernel = _mm_bias_kernel_f32out if b2d is not None else _mm_kernel_f32out
        scratch = []

    out_pad = pl.pallas_call(
        kernel,
        out_shape=jax.ShapeDtypeStruct((pm, pn), out_dtype),
        grid=grid,
        in_specs=in_specs,
        out_specs=o_spec,
        scratch_shapes=scratch,
        compiler_params=compiler_params,
        cost_estimate=cost,
    )(*operands)

    out2d = out_pad
    if (pm, pn) != (m, n_out):
        out2d = out_pad[:m, :n_out]
    return out2d.reshape(*lead, n_out)


def column_parallel_linear(x, weight, bias=None, *, compute_dtype=None):
    """Functional form: y = x @ weight.T (+ bias). weight: (output, input)."""
    assert x.shape[-1] == weight.shape[1], "input_size mismatch"
    cdt = jnp.dtype(compute_dtype) if compute_dtype is not None else jnp.dtype(x.dtype)
    wt, b2d, tn, tk = _prepare_weight(weight, bias, cdt)
    return _linear_fwd(x, wt, b2d, weight.shape[0], tn, tk, cdt)


class ColumnParallelLinearPallas:
    """ColumnParallelLinear with world_size == 1, init_data=None:
    weight = ones((output_size, input_size)), bias = zeros or None."""

    def __init__(self, input_size, output_size, bias=True, gather_output=True,
                 compute_dtype=jnp.float32):
        world_size = 1  # G_TENSOR_PARALLEL_GROUP_WORLD_SIZE == 1
        assert output_size % world_size == 0
        self.input_size = input_size
        self.output_size = output_size
        self.gather_output = gather_output
        self.output_size_per_partition = output_size // world_size
        self.compute_dtype = jnp.dtype(compute_dtype)

        # init.constant_(weight, 1.0) / bias.zero_() as in the reference module.
        self.weight = jnp.ones(
            (self.output_size_per_partition, input_size), dtype=jnp.float32
        )
        self.bias = (
            jnp.zeros((self.output_size_per_partition,), dtype=jnp.float32)
            if bias else None
        )

        # Hoisted once: transpose to (K, N), cast to MXU compute dtype, pad K/N.
        self._wt, self._b2d, self._tn, self._tk = _prepare_weight(
            self.weight, self.bias, self.compute_dtype
        )

    def __call__(self, x):
        assert x.shape[-1] == self.input_size
        # copy_to_tensor_model_parallel_region -> identity (world_size == 1)
        out = _linear_fwd(
            x, self._wt, self._b2d, self.output_size_per_partition,
            self._tn, self._tk, self.compute_dtype,
        )
        # gather_from_tensor_model_parallel_region -> identity (world_size == 1)
        # TODO(synk): all-gather along last dim via remote DMA for world_size > 1.
        return out


if __name__ == "__main__":
    key = jax.random.PRNGKey(0)
    batch, seq, input_size, output_size = 2, 8, 32, 64

    x = jax.random.normal(key, (batch, seq, input_size), dtype=jnp.float32)
    hp = jax.lax.Precision.HIGHEST

    # f32 path with bias (matches the PyTorch module defaults).
    layer = ColumnParallelLinearPallas(input_size, output_size, bias=True)
    y = jax.block_until_ready(layer(x))
    y_ref = jnp.einsum("bsk,nk->bsn", x, layer.weight, precision=hp) + layer.bias
    assert y.shape == (batch, seq, output_size)
    assert jnp.allclose(y, y_ref, atol=1e-5, rtol=1e-5), "mismatch (f32, bias)"

    # bias=False path (register_parameter('bias', None) equivalent).
    layer_nb = ColumnParallelLinearPallas(input_size, output_size, bias=False)
    y_nb = jax.block_until_ready(layer_nb(x))
    y_nb_ref = jnp.einsum("bsk,nk->bsn", x, layer_nb.weight, precision=hp)
    assert jnp.allclose(y_nb, y_nb_ref, atol=1e-5, rtol=1e-5), "mismatch (f32, no bias)"

    # bf16 MXU compute path (f32 accumulate, f32 output), checked against an
    # exact f32 reference of the bf16-rounded operands.
    layer_bf16 = ColumnParallelLinearPallas(
        input_size, output_size, bias=True, compute_dtype=jnp.bfloat16
    )
    y_bf16 = jax.block_until_ready(layer_bf16(x))
    x_r = x.astype(jnp.bfloat16).astype(jnp.float32)
    w_r = layer_bf16.weight.astype(jnp.bfloat16).astype(jnp.float32)
    y_bf16_ref = jnp.einsum("bsk,nk->bsn", x_r, w_r, precision=hp) + layer_bf16.bias
    assert jnp.allclose(y_bf16, y_bf16_ref, atol=1e-2, rtol=1e-2), "mismatch (bf16)"

    print("KERNEL_OK")
</pallas_src>

<mosaic_0001>
module attributes {stable_mosaic.version = 11 : i64} {
  func.func @_mm_bias_kernel_f32out(%arg0: i32, %arg1: i32, %arg2: i32, %arg3: memref<8x32xf32, #tpu.memory_space<vmem>>, %arg4: memref<32x64xf32, #tpu.memory_space<vmem>>, %arg5: memref<1x64xf32, #tpu.memory_space<vmem>>, %arg6: memref<8x64xf32, #tpu.memory_space<vmem>>) attributes {dimension_semantics = [#tpu.dimension_semantics<parallel>, #tpu.dimension_semantics<parallel>, #tpu.dimension_semantics<arbitrary>], iteration_bounds = array<i64: 2, 1, 1>, scalar_prefetch = 0 : i64, scratch_operands = 0 : i64, tpu.core_type = #tpu.core_type<tc>, window_params = [{transform_indices = @transform_0, window_bounds = array<i64: 8, 32>}, {transform_indices = @transform_1, window_bounds = array<i64: 32, 64>}, {transform_indices = @transform_2, window_bounds = array<i64: 1, 64>}, {transform_indices = @transform_3, window_bounds = array<i64: 8, 64>}]} {
    %c0_i32 = arith.constant 0 : i32
    %0 = arith.cmpi eq, %arg2, %c0_i32 : i32
    %1 = arith.extui %0 : i1 to i32
    %c0_i32_0 = arith.constant 0 : i32
    %2 = arith.cmpi ne, %1, %c0_i32_0 : i32
    scf.if %2 {
      %c0_8 = arith.constant 0 : index
      %c0_9 = arith.constant 0 : index
      %9 = vector.load %arg5[%c0_8, %c0_9] : memref<1x64xf32, #tpu.memory_space<vmem>>, vector<1x64xf32>
      %10 = vector.shape_cast %9 : vector<1x64xf32> to vector<1x64xf32>
      %11 = vector.broadcast %10 : vector<1x64xf32> to vector<8x64xf32>
      %c0_10 = arith.constant 0 : index
      %c0_11 = arith.constant 0 : index
      %12 = vector.load %arg6[%c0_10, %c0_11] : memref<8x64xf32, #tpu.memory_space<vmem>>, vector<8x64xf32>
      tpu.vector_store %arg6[%c0_10, %c0_11], %11 {strides = array<i32>} : memref<8x64xf32, #tpu.memory_space<vmem>>, vector<8x64xf32>,
    } else {
    }
    %c0 = arith.constant 0 : index
    %c0_1 = arith.constant 0 : index
    %3 = vector.load %arg6[%c0, %c0_1] : memref<8x64xf32, #tpu.memory_space<vmem>>, vector<8x64xf32>
    %c0_2 = arith.constant 0 : index
    %c0_3 = arith.constant 0 : index
    %4 = vector.load %arg3[%c0_2, %c0_3] : memref<8x32xf32, #tpu.memory_space<vmem>>, vector<8x32xf32>
    %c0_4 = arith.constant 0 : index
    %c0_5 = arith.constant 0 : index
    %5 = vector.load %arg4[%c0_4, %c0_5] : memref<32x64xf32, #tpu.memory_space<vmem>>, vector<32x64xf32>
    %cst = arith.constant dense<0.000000e+00> : vector<8x64xf32>
    %6 = tpu.matmul %4, %5, %cst {dimension_numbers = #tpu.dot_dimension_numbers<[1], [0], [0], [1], [0, 0, 1, 1], [], []>} : vector<8x32xf32>, vector<32x64xf32>, vector<8x64xf32> -> vector<8x64xf32>
    %7 = arith.addf %3, %6 : vector<8x64xf32>
    %c0_6 = arith.constant 0 : index
    %c0_7 = arith.constant 0 : index
    %8 = vector.load %arg6[%c0_6, %c0_7] : memref<8x64xf32, #tpu.memory_space<vmem>>, vector<8x64xf32>
    tpu.vector_store %arg6[%c0_6, %c0_7], %7 {strides = array<i32>} : memref<8x64xf32, #tpu.memory_space<vmem>>, vector<8x64xf32>,
    return
  }
  func.func @transform_0(%arg0: i32, %arg1: i32, %arg2: i32) -> (i32, i32) {
    %c0_i32 = arith.constant 0 : i32
    return %arg0, %arg2 : i32, i32
  }
  func.func @transform_1(%arg0: i32, %arg1: i32, %arg2: i32) -> (i32, i32) {
    %c0_i32 = arith.constant 0 : i32
    return %arg2, %arg1 : i32, i32
  }
  func.func @transform_2(%arg0: i32, %arg1: i32, %arg2: i32) -> (i32, i32) {
    %c0_i32 = arith.constant 0 : i32
    %c0_i32_0 = arith.constant 0 : i32
    return %c0_i32, %arg1 : i32, i32
  }
  func.func @transform_3(%arg0: i32, %arg1: i32, %arg2: i32) -> (i32, i32) {
    %c0_i32 = arith.constant 0 : i32
    return %arg0, %arg1 : i32, i32
  }
}

</mosaic_0001>

<bundles_post_ra>
// kernel: tpu_custom_call.1
= control target key start
LH: loop header
LB: loop body
LE: loop exit
PB: predicated region body
PF: predicated region fallthrough
CT: control target
= control target key end

     0   :  { %8 = vsyncpa [#allocation3], 0  ;;  %s927_s0 = inlined_call_operand.hbm [shape: f32[16,32], index: 0, kind: input, shape index: {}]   ;;  %s928_s1 = inlined_call_operand.hbm [shape: f32[32,64], index: 1, kind: input, shape index: {}]   ;;  %s929_s2 = inlined_call_operand.vmem [shape: f32[1,64], index: 2, kind: input, shape index: {}]   ;;  %s930_s3 = inlined_call_operand.hbm [shape: f32[16,64], index: 3, kind: output, shape index: {}]  }
   0x1   :  { %10 = vsyncpa [#allocation3 + $0x1], 0 }
   0x2   :  { %11 = vsyncpa [#allocation6], 0 }
   0x3   :  { %12 = vsyncpa [#allocation4], 0 }
   0x4   :  { %14 = vsyncpa [#allocation4 + $0x1], 0  ;;  %s749_s12 = smov 0   ;;  %s751_s13 = smov 0  }
   0x5   :  { %s753_s14 = smov 0   ;;  %s755_s15 = smov 0  }
   0x6   :  { %s757_s16 = smov 0   ;;  %s759_s17 = smov 0  }
   0x7 LB: > { %s471_s18 = sadd.s32 4294967295, %s720_s17   ;;  %s472_s19 = sadd.s32 4294967294, %s720_s17   ;;  %s720_s17 = sphi %s759_s17, %s20_s17   ;;  %s716_s16 = sphi %s757_s16, %s948_s16   ;;  %s712_s15 = sphi %s755_s15, %s947_s15   ;;  %s708_s14 = sphi %s753_s14, %s946_s14   ;;  %s704_s13 = sphi %s751_s13, %s945_s13   ;;  %s700_s12 = sphi %s749_s12, %s944_s12  }
   0x8   : > { %p61_p0 = scmp.ne.s32.totalorder %s704_s13, %s700_s12  ;;  %p783_p1 = scmp.eq.s32.totalorder %s471_s18, 0 }
   0x9   : > { %p787_p2 = scmp.eq.s32.totalorder %s471_s18, 1  ;;  %p147_p3 = scmp.eq.s32.totalorder %s472_s19, 1 }
   0xa   : > { %p793_p4 = por %p783_p1, %p61_p0  ;;  %p473_p5 = scmp.ge.s32.totalorder %s720_s17, 1 }
   0xb   : > { %p798_p6 = por %p147_p3, %p61_p0  ;;  %p154_p7 = scmp.lt.s32.totalorder %s720_s17, 3 }
   0xc   : > { %s934_s22 = scalar_select %p793_p4, 1, 0 }
   0xd   : > { %s935_s23 = scalar_select %p798_p6, 1, 0 }
   0xe   : > { %p803_p8 = pnand %p473_p5, %p154_p7  ;;  %s722_s25 = smov [#allocation5]  }
   0xf   : > { %s170_s26 = sshll.u32 %s722_s25, 4  ;;  %s39_s28 = sadd.s32 1, %s716_s16  ;;  %s171_s26 = int_to_ptr.vmem [resolvable:$true] %s170_s26 }
  0x10   : > { %p513_p9 = pneg %p803_p8  ;;  %s593_s29 = scalar_lea.vmem %s171_s26, 512 }
  0x11   : > { %p594_p13 = scmp.ne.s32.totalorder %s171_s26, %s593_s29  ;;  %p601_p5 = scmp.lt.s32.totalorder %s171_s26, %s171_s26 }
  0x12   : > { %p812_p11 = pnand %p513_p9, %p783_p1  ;;  %p602_p7 = scmp.lt.s32.totalorder %s593_s29, %s593_s29 }
  0x14   : > { %p584_p12 = pneg %p812_p11  ;;  %p603_p6 = por %p602_p7, %p601_p5 }
  0x16   : > { %p596_p0 = pnand %p594_p13, %p584_p12 }
  0x18   : > { %p597_p3 = pneg %p596_p0 }
  0x1a   : > { %p604_p4 = pnand %p603_p6, %p597_p3 }
  0x1c   : > { %607 = shalt.err (!%p604_p4)
}
  0x1d   : > { %s723_s30 = smov 128   ;;  %s724_s4 = smov 8  }
  0x1e   : > { %516 = dma.hbm_to_vmem [thread:$0]  (!%p812_p11), %s928_s1, 512, %s171_s26, [#allocation6], %s723_s30, %s723_s30, %s724_s4  }
  0x1f   : > { %p41_p6 = scmp.ge.s32.totalorder %s39_s28, 2  ;;  %s48_s7 = sadd.s32 1, %s708_s14 }
  0x20   : > { %p55_p4 = scmp.ne.s32.totalorder %s708_s14, %s704_s13  ;;  %p56_p9 = scmp.eq.s32.totalorder %s720_s17, 0 }
  0x21   : > { %s950_s28 = smov (%p41_p6, %s39_s28), 0  ;;  %p526_p0 = scmp.lt.s32.totalorder %s720_s17, 2 }
  0x22   : > { %p830_p12 = por %p56_p9, %p55_p4  ;;  %p836_p13 = por %p787_p2, %p55_p4 }
  0x23   : > { %s43_s10 = ssub.s32 %s716_s16, %s950_s28  ;;  %s190_s11 = sand.u32 1, %s708_s14  }
  0x24   : > { %p46_p11 = scmp.eq.s32.totalorder %s43_s10, 0  ;;  %s477_s18 = sshll.u32 %s190_s11, 3 }
  0x25   : > { %s478_s25 = sshll.u32 %s716_s16, 7  ;;  %s194_s30 = scalar_lea.vmem [#allocation2], %s477_s18 }
  0x26   : > { %s845_s19 = scalar_select %p46_p11, %s708_s14, %s48_s7  }
  0x27   : > { %s200_s29 = scalar_lea.hbm %s927_s0, %s478_s25  ;;  %s202_s4 = sshll.u32 %s194_s30, 4  ;;  %s203_s4 = int_to_ptr.vmem [resolvable:$true] %s202_s4 }
  0x28   : > { %p853_p2 = pnand %p526_p0, %p830_p12  ;;  %s191_s5 = scalar_lea.sflag [#allocation3], %s190_s11 }
  0x29   : > { %s621_s6 = scalar_lea.vmem %s203_s4, 128  ;;  %s725_s7 = smov [#allocation2]  }
  0x2a   : > { %p610_p3 = pneg %p853_p2  ;;  %p622_p5 = scmp.ne.s32.totalorder %s203_s4, %s621_s6 }
  0x2b   : > { %s626_s10 = sshll.u32 %s725_s7, 4  ;;  %s627_s10 = int_to_ptr.vmem [resolvable:$false] %s626_s10 }
  0x2c   : > { %p624_p7 = pnand %p622_p5, %p610_p3  ;;  %s628_s25 = scalar_lea.vmem %s627_s10, 256 }
  0x2d   : > { %p629_p4 = scmp.lt.s32.totalorder %s203_s4, %s627_s10  ;;  %p630_p9 = scmp.lt.s32.totalorder %s628_s25, %s621_s6 }
  0x2e   : > { %p625_p6 = pneg %p624_p7 }
  0x2f   : > { %p631_p11 = por %p630_p9, %p629_p4 }
  0x31   : > { %p632_p10 = pnand %p631_p11, %p625_p6 }
  0x33   : > { %635 = shalt.err (!%p632_p10)
}
  0x34   : > { %520 = dma.hbm_to_vmem [thread:$0]  (!%p853_p2), %s200_s29, 128, %s203_s4, %s191_s5  }
  0x35   : > { %211 = sbr.rel (%p803_p8) target bundleno = 278 (0x116), region = 32  ;;  %s864_s8 = sand.u32 (!%p803_p8), 1, %s704_s13  }
  0x36   : > { %s480_s11 = sshll.u32 (!%p803_p8), %s864_s8, 3  ;;  %s214_s18 = scalar_lea.sflag (!%p803_p8), [#allocation3], %s864_s8 }
  0x37   : > { %s217_s26 = scalar_lea.vmem (!%p803_p8), [#allocation2], %s480_s11  ;;  %p941_p12 = scmp.ne.s32.totalorder (!%p803_p8), %s934_s22, 0 }
  0x3a   : > { %687 = dma.done.wait (%p941_p12), %s214_s18, 128  }
  0x3b   : > { %689 = vsyncadd (%p941_p12), %s214_s18, 4294967168 }
  0x3c   : > { %691 = dma.done.wait (%p783_p1), [#allocation6], 512  }
  0x3d   : > { %693 = vsyncadd (%p783_p1), [#allocation6], 4294966784  ;;  %v726_v0 = vmov 0.0   ;;  %vm727_vm0 = vmmov 0   ;;  %vm262_vm1 = vcmask 523264   ;;  %v269_v1 = vld [vmem:[#allocation5 + $0x18] sm:$0xff] }
  0x3e   : > { %494 = vmatprep.subr.mxu0 %v726_v0  ;;  %502 = vmatprep.mubr.msk.f32.mxu0 %vm727_vm0, %v726_v0  ;;  %v268_v2 = vld [vmem:[#allocation5 + $0x10] sm:$0xff]  ;;  %v267_v4 = vld [vmem:[#allocation5 + $0x8] sm:$0xff]  ;;  %s246_s22 = scalar_lea.vmem [#allocation7], %s480_s11  ;;  %v266_v5 = vld [vmem:[#allocation5] sm:$0xff]  ;;  %vm270_vm2 = vcmask 261120   ;;  %s486_s20 = sshll.u32 %s712_s15, 7 }
  0x3f   : > { %495 = vmatpush3.msra.mxu0 %v269_v1  ;;  %v483_v3 = vld [vmem:[%s929_s2] ss:$0 sm:$0xff]  ;;  %s362_s29 = sshll.u32 %s246_s22, 4  ;;  %s884_s21 = scalar_lea.hbm %s930_s3, %s486_s20  ;;  %s363_s29 = int_to_ptr.vmem [resolvable:$true] %s362_s29 }
  0x40   : > { %496 = vmatprep.subr.mxu0 %v726_v0  ;;  %263 = vst.msk [vmem:[%s246_s22] sm:$0xff] %vm262_vm1, %v483_v3  ;;  %v265_v6 = vld [vmem:[%s217_s26] sm:$0xff]  ;;  %s348_s5 = scalar_lea.sflag [#allocation4], %s864_s8  ;;  %s636_s6 = scalar_lea.vmem %s363_s29, 128 }
  0x41   : > { %497 = vmatpush3.msra.mxu0 %v268_v2  ;;  %p637_p1 = scmp.ne.s32.totalorder %s363_s29, %s636_s6  ;;  %s728_s7 = smov [#allocation7]  }
  0x42   : > { %498 = vmatprep.subr.mxu0 %v726_v0  ;;  %s640_s15 = sshll.u32 %s728_s7, 4  ;;  %s641_s15 = int_to_ptr.vmem [resolvable:$false] %s640_s15 }
  0x43   : > { %499 = vmatpush3.msra.mxu0 %v267_v4  ;;  %p638_p8 = pnand %p637_p1, %p836_p13  ;;  %s642_s10 = scalar_lea.vmem %s641_s15, 256 }
  0x44   : > { %500 = vmatprep.subr.mxu0 %v726_v0  ;;  %p643_p0 = scmp.lt.s32.totalorder %s363_s29, %s641_s15  ;;  %p644_p2 = scmp.lt.s32.totalorder %s642_s10, %s636_s6 }
  0x45   : > { %501 = vmatpush3.msra.mxu0 %v266_v5  ;;  %p639_p10 = pneg %p638_p8 }
  0x46   : > { %503 = vmatmul.mubr.msk.f32.vlgmr.msra.gmra.mxu0 %vm270_vm2, %v265_v6  ;;  %p645_p3 = por %p644_p2, %p643_p0 }
  0x47   : > { %v264_v7 = vld [vmem:[%s246_s22] sm:$0xff] }
  0x48   : > { %p646_p5 = pnand %p645_p3, %p639_p10 }
 0x106   : > { %v340_v8 = vpop.f32.mrf.mxu0 }
 0x107   : > { %v344_v9 = vadd.f32 %v340_v8, %v264_v7 }
 0x108   : > { %v504_v10 = vpop.f32.mrf.mxu0 }
 0x109   : > { %346 = vst.msk [vmem:[%s246_s22] sm:$0xff] %vm262_vm1, %v344_v9 }
 0x10a   : > { %649 = shalt.err (!%p646_p5)
}
 0x10b   : > { %s650_s25 = scalar_lea.hbm %s884_s21, 128  ;;  %s654_s18 = scalar_lea.hbm %s930_s3, 256 }
 0x10c   : > { %p651_p7 = scmp.ne.s32.totalorder %s884_s21, %s650_s25  ;;  %p655_p9 = scmp.lt.s32.totalorder %s884_s21, %s930_s3 }
 0x10d   : > { %p656_p11 = scmp.lt.s32.totalorder %s654_s18, %s650_s25 }
 0x10e   : > { %p652_p6 = pnand %p651_p7, %p836_p13 }
 0x10f   : > { %p657_p12 = por %p656_p11, %p655_p9 }
 0x110   : > { %p653_p4 = pneg %p652_p6 }
 0x112   : > { %p658_p1 = pnand %p657_p12, %p653_p4 }
 0x114   : > { %661 = shalt.err (!%p658_p1)
}
 0x115   : > { %511 = dma.vmem_to_hbm [thread:$0]  (%p836_p13), %s363_s29, 128, %s884_s21, %s348_s5  }
 0x116 PF: > { %s374_s27 = sand.u32 1, %s700_s12   ;;  %p942_p8 = scmp.ne.s32.totalorder %s935_s23, 0 }
 0x117   : > { %p943_p10 = scmp.ge.s32.totalorder %s720_s17, 2  ;;  %s375_s22 = scalar_lea.sflag [#allocation4], %s374_s27 }
 0x119   : > { %p522_p0 = pnand %p943_p10, %p942_p8 }
 0x11b   : > { %p523_p2 = pneg %p522_p0 }
 0x11d   : > { %695 = dma.done.wait (%p523_p2), %s375_s22, 128  }
 0x11e   : > { %697 = vsyncadd (%p523_p2), %s375_s22, 4294967168  ;;  %s20_s17 = sadd.s32 1, %s720_s17   ;;  %s944_s12 = smov %s704_s13 }
 0x11f   : > { %p17_p3 = scmp.ge.s32.totalorder %s20_s17, 4   ;;  %s945_s13 = smov %s708_s14 }
 0x120   : > { %s946_s14 = smov %s845_s19  ;;  %s947_s15 = smov %s716_s16 }
 0x121   : > { %s948_s16 = smov %s950_s28  ;;  %19 = sbr.rel (!%p17_p3) target bundleno = 7 (0x7), region = 89 }
 0x126   :  { %380 = vsyncpa [#allocation3], 1 }
 0x127   :  { %382 = vsyncpa [#allocation3 + $0x1], 1 }
 0x128   :  { %383 = vsyncpa [#allocation6], 1 }
 0x129   :  { %384 = vsyncpa [#allocation4], 1 }
 0x12a   :  { %386 = vsyncpa [#allocation4 + $0x1], 1 }

</bundles_post_ra>
